<compile_context>
chip_gen: v7x
topology: tpu7x:2x2x1
jax: 0.10.0
libtpu: 0.0.40
codegen_flags: <defaults>
</compile_context>

<pallas_src>
import functools

import jax
import jax.numpy as jnp
from jax.experimental import pallas as pl
from jax.experimental.pallas import tpu as pltpu


# ---------------------------------------------------------------------------
# Kernels
# ---------------------------------------------------------------------------
def _mlp_resident_kernel(x_ref, w1_ref, b1_ref, w2_ref, b2_ref, o_ref, *,
                         gelu_approximate):
    """Token-tiled fused MLP with W1/b1/W2/b2 fully VMEM-resident.

    x_ref:  (TM, D)   activation tile
    w1_ref: (D, H)    fc1 weight (resident)
    b1_ref: (1, H)    fc1 bias (resident)
    w2_ref: (H, D)    fc2 weight (resident)
    b2_ref: (1, D)    fc2 bias (resident)
    o_ref:  (TM, D)   output tile
    """
    h = jnp.dot(x_ref[...], w1_ref[...], preferred_element_type=jnp.float32)
    h = h + b1_ref[...].astype(jnp.float32)
    h = jax.nn.gelu(h, approximate=gelu_approximate)
    y = jnp.dot(h.astype(w2_ref.dtype), w2_ref[...],
                preferred_element_type=jnp.float32)
    y = y + b2_ref[...].astype(jnp.float32)
    # TODO(synk): training-mode dropout (pltpu.prng_seed / prng_random_bits
    # masking) not applied; eval mode => identity.
    o_ref[...] = y.astype(o_ref.dtype)


def _mlp_stream_kernel(x_ref, w1_ref, b1_ref, w2_ref, b2_ref, o_ref, acc_ref,
                       *, th, gelu_approximate):
    """One (token-tile, hidden-tile) step with streamed W1/W2 tiles.

    x_ref:  (TM, D)   activation tile (resident across the hidden axis)
    w1_ref: (D, TH)   fc1 weight tile (streamed)
    b1_ref: (1, H)    fc1 bias (fully resident; sliced in-kernel)
    w2_ref: (TH, D)   fc2 weight tile (streamed)
    b2_ref: (1, D)    fc2 bias (fully resident)
    o_ref:  (TM, D)   output tile (written at the last hidden step)
    acc_ref:(TM, D)   f32 accumulator scratch for fc2 partial sums
    """
    h_idx = pl.program_id(1)

    @pl.when(h_idx == 0)
    def _():
        # Fold b2 into the accumulator init (drops a (TM, D) epilogue add).
        acc_ref[...] = jnp.broadcast_to(
            b2_ref[...].astype(jnp.float32), acc_ref.shape)

    # fc1 partial: (TM, D) @ (D, TH) -> (TM, TH), f32 accumulation on the MXU.
    h = jnp.dot(x_ref[...], w1_ref[...], preferred_element_type=jnp.float32)
    start = pl.multiple_of(h_idx * th, th)
    h = h + b1_ref[:, pl.ds(start, th)].astype(jnp.float32)
    h = jax.nn.gelu(h, approximate=gelu_approximate)

    # fc2 partial: cast back to the MXU-native input dtype, accumulate in f32.
    acc_ref[...] += jnp.dot(h.astype(w2_ref.dtype), w2_ref[...],
                            preferred_element_type=jnp.float32)

    @pl.when(h_idx == pl.num_programs(1) - 1)
    def _():
        # TODO(synk): training-mode dropout not applied; eval mode => identity.
        o_ref[...] = acc_ref[...].astype(o_ref.dtype)


# ---------------------------------------------------------------------------
# Wrapper
# ---------------------------------------------------------------------------
def _round_up(x, m):
    return (x + m - 1) // m * m


def _vmem_budget_bytes():
    """Generation-aware VMEM budget with headroom for compiler scratch."""
    try:
        cap = int(pltpu.get_tpu_info().vmem_capacity_bytes)
    except Exception:  # non-TPU / interpret fallback: assume v7x-like 64 MiB
        cap = 64 << 20
    # ~75% of physical, always leaving >=16 MiB free:
    #   128 MiB (v5e/v6e) -> 96 MiB ; 64 MiB per-TC (v7x) -> 48 MiB.
    return int(max(min(cap * 3 // 4, cap - (16 << 20)), 32 << 20))


@functools.partial(
    jax.jit,
    static_argnames=("block_tokens", "block_hidden", "gelu_approximate",
                     "force_streaming"),
)
def mlp_pallas(x, w1, b1, w2, b2, *, block_tokens=512, block_hidden=512,
               gelu_approximate=True, force_streaming=False):
    """Fused MLP forward.

    x:  (T, D)   tokens x features (caller flattens batch*seq)
    w1: (D, H)   fc1 weight (transposed vs. nn.Linear), H = 4*D
    b1: (1, H)   fc1 bias
    w2: (H, D)   fc2 weight (transposed vs. nn.Linear)
    b2: (1, D)   fc2 bias
    """
    T, D = x.shape
    H = w1.shape[1]
    assert w1.shape == (D, H) and w2.shape == (H, D)
    assert b1.shape == (1, H) and b2.shape == (1, D)
    # Lane-dense output blocks (avoid masked vst.msk partial stores).
    assert D % 128 == 0, "n_dim must be a multiple of 128 (pad the model dim)"

    x_it = x.dtype.itemsize
    w_it = w1.dtype.itemsize
    b_it = b1.dtype.itemsize
    budget = _vmem_budget_bytes()

    # ----- token tile --------------------------------------------------------
    tm = min(block_tokens, _round_up(T, 8))
    # Ensure >=2 token tiles when tokens allow, so the "parallel" axis shards
    # across v7x's 2 TensorCores (neutral on single-TC v5e/v6e).
    if _round_up(T, tm) // tm < 2 and T >= 512:
        tm = max(256, _round_up(-(-T // 2), 256))

    resident_w_bytes = 2 * D * H * w_it + H * b_it + D * b_it

    def resident_est(tm_):
        return (resident_w_bytes
                + 2 * tm_ * D * x_it      # x tile (double-buffered)
                + 2 * tm_ * D * x_it      # out tile (double-buffered)
                + tm_ * H * 6             # (tm, H) f32 GELU value + bf16 cast
                + tm_ * D * 4)            # f32 fc2 result before output cast

    def stream_est(tm_, th_):
        return (2 * tm_ * D * x_it        # x tile (double-buffered)
                + 2 * D * th_ * w_it      # W1 tile (double-buffered)
                + 2 * th_ * D * w_it      # W2 tile (double-buffered)
                + H * b_it + D * b_it     # resident biases
                + 2 * tm_ * D * x_it      # out tile (double-buffered)
                + tm_ * D * 4             # f32 accumulator scratch
                + tm_ * th_ * 6)          # (tm, th) f32 GELU value + bf16 cast

    # ----- path selection ----------------------------------------------------
    use_resident = (not force_streaming) and resident_est(tm) <= budget
    if (not force_streaming) and not use_resident:
        # Weights might fit if we shrink the token tile first.
        tm_try = tm
        while tm_try > 256 and resident_est(tm_try) > budget:
            tm_try = max(256, tm_try // 2)
        if resident_est(tm_try) <= budget:
            tm, use_resident = tm_try, True

    th = None
    if not use_resident:
        # Hidden tile: multiple of 256 (full 2x256x256 MXU pushes on v6e/v7x);
        # H = 4*D with D % 128 == 0 guarantees 256 | H and 512 | H.
        th_candidates = [c for c in (1024, 512, 256)
                         if c <= max(block_hidden, 256) and H % c == 0]
        th = th_candidates[-1]
        for c in th_candidates:
            if stream_est(tm, c) <= budget:
                th = c
                break
        while stream_est(tm, th) > budget and tm > 256:
            tm = max(256, tm // 2)

    # ----- ragged-tail padding ----------------------------------------------
    Tp = _round_up(T, tm)
    xp = jnp.pad(x, ((0, Tp - T), (0, 0))) if Tp != T else x
    n_tok_tiles = Tp // tm

    if use_resident:
        kernel = functools.partial(_mlp_resident_kernel,
                                   gelu_approximate=gelu_approximate)
        vmem_limit = int(min(budget, max(resident_est(tm) * 5 // 4, 16 << 20)))
        out = pl.pallas_call(
            kernel,
            out_shape=jax.ShapeDtypeStruct((Tp, D), x.dtype),
            grid_spec=pltpu.PrefetchScalarGridSpec(
                num_scalar_prefetch=0,
                grid=(n_tok_tiles,),
                in_specs=[
                    pl.BlockSpec((tm, D), lambda i: (i, 0)),            # x
                    pl.BlockSpec(memory_space=pltpu.MemorySpace.VMEM),  # W1
                    pl.BlockSpec(memory_space=pltpu.MemorySpace.VMEM),  # b1
                    pl.BlockSpec(memory_space=pltpu.MemorySpace.VMEM),  # W2
                    pl.BlockSpec(memory_space=pltpu.MemorySpace.VMEM),  # b2
                ],
                out_specs=pl.BlockSpec((tm, D), lambda i: (i, 0)),
            ),
            compiler_params=pltpu.CompilerParams(
                dimension_semantics=("parallel",),
                vmem_limit_bytes=vmem_limit,
            ),
        )(xp, w1, b1, w2, b2)
    else:
        kernel = functools.partial(_mlp_stream_kernel, th=th,
                                   gelu_approximate=gelu_approximate)
        vmem_limit = int(min(budget, max(stream_est(tm, th) * 5 // 4, 16 << 20)))
        out = pl.pallas_call(
            kernel,
            out_shape=jax.ShapeDtypeStruct((Tp, D), x.dtype),
            grid_spec=pltpu.PrefetchScalarGridSpec(
                num_scalar_prefetch=0,
                grid=(n_tok_tiles, H // th),
                in_specs=[
                    # x tile: resident across the hidden (reduction) axis.
                    pl.BlockSpec((tm, D), lambda i, h: (i, 0)),
                    # Streamed weight tiles over the hidden axis.  (If profiling
                    # shows exposed DMA at short hidden steps, add
                    # pipeline_mode=pl.Buffered(3) here.)
                    pl.BlockSpec((D, th), lambda i, h: (0, h)),
                    # Biases: fully VMEM-resident, single-buffered.
                    pl.BlockSpec(memory_space=pltpu.MemorySpace.VMEM),
                    pl.BlockSpec((th, D), lambda i, h: (h, 0)),
                    pl.BlockSpec(memory_space=pltpu.MemorySpace.VMEM),
                ],
                out_specs=pl.BlockSpec((tm, D), lambda i, h: (i, 0)),
                scratch_shapes=[pltpu.VMEM((tm, D), jnp.float32)],
            ),
            compiler_params=pltpu.CompilerParams(
                dimension_semantics=("parallel", "arbitrary"),
                vmem_limit_bytes=vmem_limit,
            ),
        )(xp, w1, b1, w2, b2)

    return out[:T] if Tp != T else out


# ---------------------------------------------------------------------------
# Pure-JAX reference (mirrors kernel numerics: f32 math, bf16 h before fc2)
# ---------------------------------------------------------------------------
def _mlp_reference(x, w1, b1, w2, b2, *, gelu_approximate=True):
    xf = x.astype(jnp.float32)
    h = xf @ w1.astype(jnp.float32) + b1.astype(jnp.float32)
    h = jax.nn.gelu(h, approximate=gelu_approximate)
    h = h.astype(w2.dtype).astype(jnp.float32)
    y = h @ w2.astype(jnp.float32) + b2.astype(jnp.float32)
    return y.astype(x.dtype)


if __name__ == "__main__":
    # Small config consistent with the module: batch=2, seq=8, n_dim=128,
    # hidden = 4 * n_dim = 512, bias=True, dropout inactive (eval mode).
    batch, seq, n_dim = 2, 8, 128
    hidden = 4 * n_dim

    key = jax.random.PRNGKey(0)
    kx, kw1, kb1, kw2, kb2 = jax.random.split(key, 5)

    # bf16 activations/weights (native MXU input dtype); f32 biases.
    x = jax.random.normal(kx, (batch, seq, n_dim), dtype=jnp.float32)
    x = x.astype(jnp.bfloat16)

    # Deterministic init mimicking nn.Linear's U(-1/sqrt(fan_in), 1/sqrt(fan_in)).
    s1 = 1.0 / jnp.sqrt(jnp.float32(n_dim))
    s2 = 1.0 / jnp.sqrt(jnp.float32(hidden))
    w1 = jax.random.uniform(kw1, (n_dim, hidden), jnp.float32, -s1, s1).astype(jnp.bfloat16)
    b1 = jax.random.uniform(kb1, (1, hidden), jnp.float32, -s1, s1)
    w2 = jax.random.uniform(kw2, (hidden, n_dim), jnp.float32, -s2, s2).astype(jnp.bfloat16)
    b2 = jax.random.uniform(kb2, (1, n_dim), jnp.float32, -s2, s2)

    # Flatten (batch, seq, n_dim) -> (tokens, n_dim) for the kernel hot path.
    x2d = x.reshape(batch * seq, n_dim)
    ref = _mlp_reference(x2d, w1, b1, w2, b2).reshape(batch, seq, n_dim)

    # Fast path: weights fully VMEM-resident.
    out_res = mlp_pallas(x2d, w1, b1, w2, b2).reshape(batch, seq, n_dim)
    jax.block_until_ready(out_res)
    assert out_res.shape == (batch, seq, n_dim)
    assert jnp.allclose(out_res.astype(jnp.float32), ref.astype(jnp.float32),
                        atol=5e-2, rtol=5e-2), "resident path mismatch vs reference"

    # Streaming path (forced; block_hidden=256 exercises the hidden-axis
    # reduction, the f32 accumulator, and the b2-folded init).
    out_str = mlp_pallas(x2d, w1, b1, w2, b2, block_hidden=256,
                         force_streaming=True).reshape(batch, seq, n_dim)
    jax.block_until_ready(out_str)
    assert jnp.allclose(out_str.astype(jnp.float32), ref.astype(jnp.float32),
                        atol=5e-2, rtol=5e-2), "streaming path mismatch vs reference"

    print("KERNEL_OK")
</pallas_src>

<mosaic_0001>
module attributes {stable_mosaic.version = 11 : i64} {
  func.func @_mlp_resident_kernel(%arg0: i32, %arg1: memref<16x128xbf16, #tpu.memory_space<vmem>>, %arg2: memref<128x512xbf16, #tpu.memory_space<vmem>>, %arg3: memref<1x512xf32, #tpu.memory_space<vmem>>, %arg4: memref<512x128xbf16, #tpu.memory_space<vmem>>, %arg5: memref<1x128xf32, #tpu.memory_space<vmem>>, %arg6: memref<16x128xbf16, #tpu.memory_space<vmem>>) attributes {dimension_semantics = [#tpu.dimension_semantics<parallel>], iteration_bounds = array<i64: 1>, scalar_prefetch = 0 : i64, scratch_operands = 0 : i64, tpu.core_type = #tpu.core_type<tc>, window_params = [{transform_indices = @transform_0, window_bounds = array<i64: 16, 128>}, {pipeline_mode = #tpu.pipeline_mode<synchronous>, transform_indices = @transform_1, window_bounds = array<i64: 128, 512>}, {pipeline_mode = #tpu.pipeline_mode<synchronous>, transform_indices = @transform_2, window_bounds = array<i64: 1, 512>}, {pipeline_mode = #tpu.pipeline_mode<synchronous>, transform_indices = @transform_3, window_bounds = array<i64: 512, 128>}, {pipeline_mode = #tpu.pipeline_mode<synchronous>, transform_indices = @transform_4, window_bounds = array<i64: 1, 128>}, {transform_indices = @transform_5, window_bounds = array<i64: 16, 128>}]} {
    %c0 = arith.constant 0 : index
    %c0_0 = arith.constant 0 : index
    %0 = vector.load %arg1[%c0, %c0_0] : memref<16x128xbf16, #tpu.memory_space<vmem>>, vector<16x128xbf16>
    %c0_1 = arith.constant 0 : index
    %c0_2 = arith.constant 0 : index
    %1 = vector.load %arg2[%c0_1, %c0_2] : memref<128x512xbf16, #tpu.memory_space<vmem>>, vector<128x512xbf16>
    %cst = arith.constant dense<0.000000e+00> : vector<16x512xf32>
    %2 = tpu.matmul %0, %1, %cst {dimension_numbers = #tpu.dot_dimension_numbers<[1], [0], [0], [1], [0, 0, 1, 1], [], []>} : vector<16x128xbf16>, vector<128x512xbf16>, vector<16x512xf32> -> vector<16x512xf32>
    %c0_3 = arith.constant 0 : index
    %c0_4 = arith.constant 0 : index
    %3 = vector.load %arg3[%c0_3, %c0_4] : memref<1x512xf32, #tpu.memory_space<vmem>>, vector<1x512xf32>
    %4 = vector.broadcast %3 : vector<1x512xf32> to vector<16x512xf32>
    %5 = arith.addf %2, %4 : vector<16x512xf32>
    %6 = arith.mulf %5, %5 : vector<16x512xf32>
    %7 = arith.mulf %5, %6 : vector<16x512xf32>
    %cst_5 = arith.constant 4.471500e-02 : f32
    %8 = vector.broadcast %cst_5 : f32 to vector<16x512xf32>
    %9 = arith.mulf %8, %7 : vector<16x512xf32>
    %10 = arith.addf %5, %9 : vector<16x512xf32>
    %cst_6 = arith.constant 0.797884583 : f32
    %11 = vector.broadcast %cst_6 : f32 to vector<16x512xf32>
    %12 = arith.mulf %11, %10 : vector<16x512xf32>
    %13 = math.tanh %12 : vector<16x512xf32>
    %cst_7 = arith.constant 1.000000e+00 : f32
    %14 = vector.broadcast %cst_7 : f32 to vector<16x512xf32>
    %15 = arith.addf %14, %13 : vector<16x512xf32>
    %cst_8 = arith.constant 5.000000e-01 : f32
    %16 = vector.broadcast %cst_8 : f32 to vector<16x512xf32>
    %17 = arith.mulf %16, %15 : vector<16x512xf32>
    %18 = arith.mulf %5, %17 : vector<16x512xf32>
    %19 = arith.truncf %18 : vector<16x512xf32> to vector<16x512xbf16>
    %c0_9 = arith.constant 0 : index
    %c0_10 = arith.constant 0 : index
    %20 = vector.load %arg4[%c0_9, %c0_10] : memref<512x128xbf16, #tpu.memory_space<vmem>>, vector<512x128xbf16>
    %cst_11 = arith.constant dense<0.000000e+00> : vector<16x128xf32>
    %21 = tpu.matmul %19, %20, %cst_11 {dimension_numbers = #tpu.dot_dimension_numbers<[1], [0], [0], [1], [0, 0, 1, 1], [], []>} : vector<16x512xbf16>, vector<512x128xbf16>, vector<16x128xf32> -> vector<16x128xf32>
    %c0_12 = arith.constant 0 : index
    %c0_13 = arith.constant 0 : index
    %22 = vector.load %arg5[%c0_12, %c0_13] : memref<1x128xf32, #tpu.memory_space<vmem>>, vector<1x128xf32>
    %23 = vector.broadcast %22 : vector<1x128xf32> to vector<16x128xf32>
    %24 = arith.addf %21, %23 : vector<16x128xf32>
    %25 = arith.truncf %24 : vector<16x128xf32> to vector<16x128xbf16>
    %c0_14 = arith.constant 0 : index
    %c0_15 = arith.constant 0 : index
    %26 = vector.load %arg6[%c0_14, %c0_15] : memref<16x128xbf16, #tpu.memory_space<vmem>>, vector<16x128xbf16>
    tpu.vector_store %arg6[%c0_14, %c0_15], %25 {strides = array<i32>} : memref<16x128xbf16, #tpu.memory_space<vmem>>, vector<16x128xbf16>,
    return
  }
  func.func @transform_0(%arg0: i32) -> (i32, i32) {
    %c0_i32 = arith.constant 0 : i32
    %c0_i32_0 = arith.constant 0 : i32
    return %arg0, %c0_i32 : i32, i32
  }
  func.func @transform_1(%arg0: i32) -> (i32, i32) {
    %c0_i32 = arith.constant 0 : i32
    %c0_i32_0 = arith.constant 0 : i32
    %c0_i32_1 = arith.constant 0 : i32
    return %c0_i32, %c0_i32_0 : i32, i32
  }
  func.func @transform_2(%arg0: i32) -> (i32, i32) {
    %c0_i32 = arith.constant 0 : i32
    %c0_i32_0 = arith.constant 0 : i32
    %c0_i32_1 = arith.constant 0 : i32
    return %c0_i32, %c0_i32_0 : i32, i32
  }
  func.func @transform_3(%arg0: i32) -> (i32, i32) {
    %c0_i32 = arith.constant 0 : i32
    %c0_i32_0 = arith.constant 0 : i32
    %c0_i32_1 = arith.constant 0 : i32
    return %c0_i32, %c0_i32_0 : i32, i32
  }
  func.func @transform_4(%arg0: i32) -> (i32, i32) {
    %c0_i32 = arith.constant 0 : i32
    %c0_i32_0 = arith.constant 0 : i32
    %c0_i32_1 = arith.constant 0 : i32
    return %c0_i32, %c0_i32_0 : i32, i32
  }
  func.func @transform_5(%arg0: i32) -> (i32, i32) {
    %c0_i32 = arith.constant 0 : i32
    %c0_i32_0 = arith.constant 0 : i32
    return %arg0, %c0_i32 : i32, i32
  }
}

</mosaic_0001>

<bundles_post_ra>
// kernel: mlp_pallas.1
= control target key start
LH: loop header
LB: loop body
LE: loop exit
PB: predicated region body
PF: predicated region fallthrough
CT: control target
= control target key end

     0   :  { %10 = vsyncpa [#allocation3], 0  ;;  %s1297_s0 = inlined_call_operand.hbm [shape: bf16[16,128], index: 0, kind: input, shape index: {}]   ;;  %s1298_s1 = inlined_call_operand.hbm [shape: bf16[128,512], index: 1, kind: input, shape index: {}]   ;;  %s1299_s2 = inlined_call_operand.vmem [shape: f32[1,512], index: 2, kind: input, shape index: {}]   ;;  %s1300_s3 = inlined_call_operand.hbm [shape: bf16[512,128], index: 3, kind: input, shape index: {}]   ;;  %s1301_s4 = inlined_call_operand.vmem [shape: f32[1,128], index: 4, kind: input, shape index: {}]   ;;  %s1302_s5 = inlined_call_operand.hbm [shape: bf16[16,128], index: 5, kind: output, shape index: {}]  }
   0x1   :  { %11 = vsyncpa [#allocation6], 0 }
   0x2   :  { %12 = vsyncpa [#allocation4], 0  ;;  %s1139_s18 = smov [#allocation5]   ;;  %s1045_s22 = scalar_lea.hbm %s1298_s1, 4096 }
   0x3   :  { %s30_s19 = sshll.u32 %s1139_s18, 4  ;;  %p1046_p0 = scmp.ne.s32.totalorder %s1298_s1, %s1045_s22  ;;  %s31_s19 = int_to_ptr.vmem [resolvable:$true] %s30_s19 }
   0x4   :  { %p1049_p1 = scmp.lt.u32.totalorder %s1045_s22, %s1298_s1 }
   0x6   :  { %p1051_p2 = pnand %p1049_p1, %p1046_p0 }
   0x8   :  { %1054 = shalt.err (!%p1051_p2)
}
   0x9   :  { %s1055_s27 = scalar_lea.vmem %s31_s19, 4096  ;;  %p1060_p4 = scmp.lt.s32.totalorder %s31_s19, %s31_s19 }
   0xa   :  { %p1056_p3 = scmp.ne.s32.totalorder %s31_s19, %s1055_s27  ;;  %p1061_p5 = scmp.lt.s32.totalorder %s1055_s27, %s1055_s27 }
   0xc   :  { %p1062_p6 = por %p1061_p5, %p1060_p4 }
   0xe   :  { %p1063_p7 = pnand %p1062_p6, %p1056_p3 }
  0x10   :  { %1066 = shalt.err (!%p1063_p7)
}
  0x11   :  { %s1140_s28 = smov 256   ;;  %s1141_s29 = smov 16  }
  0x12   :  { %36 = dma.hbm_to_vmem [thread:$0]  %s1298_s1, 4096, %s31_s19, [#allocation6], %s1140_s28, %s1140_s28, %s1141_s29  }
  0x13   :  { %s1142_s7 = smov [#allocation2]   ;;  %s1067_s11 = scalar_lea.hbm %s1297_s0, 128 }
  0x14   :  { %s18_s8 = sshll.u32 %s1142_s7, 4  ;;  %p1068_p8 = scmp.ne.s32.totalorder %s1297_s0, %s1067_s11  ;;  %s19_s8 = int_to_ptr.vmem [resolvable:$true] %s18_s8 }
  0x15   :  { %p1071_p9 = scmp.lt.u32.totalorder %s1067_s11, %s1297_s0 }
  0x17   :  { %p1073_p10 = pnand %p1071_p9, %p1068_p8 }
  0x19   :  { %1076 = shalt.err (!%p1073_p10)
}
  0x1a   :  { %s1077_s16 = scalar_lea.vmem %s19_s8, 128  ;;  %p1082_p12 = scmp.lt.s32.totalorder %s19_s8, %s19_s8 }
  0x1b   :  { %p1078_p11 = scmp.ne.s32.totalorder %s19_s8, %s1077_s16  ;;  %p1083_p13 = scmp.lt.s32.totalorder %s1077_s16, %s1077_s16 }
  0x1d   :  { %p1084_p0 = por %p1083_p13, %p1082_p12 }
  0x1f   :  { %p1085_p1 = pnand %p1084_p0, %p1078_p11 }
  0x21   :  { %1088 = shalt.err (!%p1085_p1)
}
  0x22   :  { %s1143_s1 = smov 64   ;;  %s1144_s17 = smov 4  }
  0x23   :  { %24 = dma.hbm_to_vmem [thread:$0]  %s1297_s0, 128, %s19_s8, [#allocation3], %s1143_s1, %s1143_s1, %s1144_s17  }
  0x24   :  { %s1145_s20 = smov [#allocation7]   ;;  %s1089_s24 = scalar_lea.hbm %s1300_s3, 4096 }
  0x25   :  { %s44_s21 = sshll.u32 %s1145_s20, 4  ;;  %p1090_p2 = scmp.ne.s32.totalorder %s1300_s3, %s1089_s24  ;;  %s45_s21 = int_to_ptr.vmem [resolvable:$true] %s44_s21 }
  0x26   :  { %p1093_p3 = scmp.lt.u32.totalorder %s1089_s24, %s1300_s3 }
  0x28   :  { %p1095_p4 = pnand %p1093_p3, %p1090_p2 }
  0x2a   :  { %1098 = shalt.err (!%p1095_p4)
}
  0x2b   :  { %s1099_s29 = scalar_lea.vmem %s45_s21, 4096  ;;  %p1104_p6 = scmp.lt.s32.totalorder %s45_s21, %s45_s21 }
  0x2c   :  { %p1100_p5 = scmp.ne.s32.totalorder %s45_s21, %s1099_s29  ;;  %p1105_p7 = scmp.lt.s32.totalorder %s1099_s29, %s1099_s29 }
  0x2e   :  { %p1106_p8 = por %p1105_p7, %p1104_p6 }
  0x30   :  { %p1107_p9 = pnand %p1106_p8, %p1100_p5 }
  0x32   :  { %1110 = shalt.err (!%p1107_p9)
}
  0x33   :  { %50 = dma.hbm_to_vmem [thread:$0]  %s1300_s3, 4096, %s45_s21, [#allocation6], %s1143_s1, %s1143_s1, %s1144_s17  }
  0x34   :  { %1133 = dma.done.wait [#allocation3], 128  }
  0x35   :  { %1134 = vsyncadd [#allocation3], 4294967168 }
  0x36   :  { %1135 = dma.done.wait [#allocation6], 8192  }
  0x37   :  { %1136 = vsyncadd [#allocation6], 4294959104  ;;  %v1146_v0 = vmov 0   ;;  %v948_v1 = vld [vmem:[#allocation5 + $0x4] ss:$16 sps:$4 sm:$0xff]   ;;  %v996_v33 = vld [vmem:[#allocation2] sm:$0xff]  }
  0x38   :  { %317 = vmatprep.mubr.bf16.mxu0 %v1146_v0  ;;  %360 = vmatprep.mubr.bf16.mxu1 %v1146_v0  ;;  %v950_v2 = vld [vmem:[#allocation5 + $0xc] ss:$16 sps:$4 sm:$0xff]   ;;  %v952_v3 = vld [vmem:[#allocation5] ss:$16 sps:$4 sm:$0xff]   ;;  %v953_v4 = vld [vmem:[#allocation5 + $0x8] ss:$16 sps:$4 sm:$0xff]  }
  0x39   :  { %285 = vmatprep.subr.bf16.mxu0 %v948_v1  ;;  %328 = vmatprep.subr.bf16.mxu1 %v950_v2  ;;  %v954_v5 = vld [vmem:[#allocation5 + $0x24] ss:$16 sps:$4 sm:$0xff]   ;;  %v956_v6 = vld [vmem:[#allocation5 + $0x2c] ss:$16 sps:$4 sm:$0xff]   ;;  %v958_v7 = vld [vmem:[#allocation5 + $0x20] ss:$16 sps:$4 sm:$0xff]   ;;  %v99_v2 = vlaneseq }
  0x3a   :  { %286 = vmatpush1.bf16.msra.mxu0 %v952_v3  ;;  %329 = vmatpush1.bf16.msra.mxu1 %v953_v4  ;;  %v959_v8 = vld [vmem:[#allocation5 + $0x28] ss:$16 sps:$4 sm:$0xff]   ;;  %v960_v9 = vld [vmem:[#allocation5 + $0x44] ss:$16 sps:$4 sm:$0xff]   ;;  %v962_v10 = vld [vmem:[#allocation5 + $0x4c] ss:$16 sps:$4 sm:$0xff]  }
  0x3b   :  { %287 = vmatprep.subr.bf16.mxu0 %v954_v5  ;;  %330 = vmatprep.subr.bf16.mxu1 %v956_v6  ;;  %v964_v11 = vld [vmem:[#allocation5 + $0x40] ss:$16 sps:$4 sm:$0xff]   ;;  %v965_v12 = vld [vmem:[#allocation5 + $0x48] ss:$16 sps:$4 sm:$0xff]   ;;  %v966_v13 = vld [vmem:[#allocation5 + $0x64] ss:$16 sps:$4 sm:$0xff]  }
  0x3c   :  { %v968_v14 = vld [vmem:[#allocation5 + $0x6c] ss:$16 sps:$4 sm:$0xff]   ;;  %v970_v15 = vld [vmem:[#allocation5 + $0x60] ss:$16 sps:$4 sm:$0xff]   ;;  %v971_v16 = vld [vmem:[#allocation5 + $0x68] ss:$16 sps:$4 sm:$0xff]  }
  0x3d   :  { %v972_v17 = vld [vmem:[#allocation5 + $0x84] ss:$16 sps:$4 sm:$0xff]   ;;  %v974_v18 = vld [vmem:[#allocation5 + $0x8c] ss:$16 sps:$4 sm:$0xff]   ;;  %v976_v19 = vld [vmem:[#allocation5 + $0x80] ss:$16 sps:$4 sm:$0xff]  }
  0x3e   :  { %288 = vmatpush1.bf16.msra.mxu0 %v958_v7  ;;  %331 = vmatpush1.bf16.msra.mxu1 %v959_v8  ;;  %v977_v20 = vld [vmem:[#allocation5 + $0x88] ss:$16 sps:$4 sm:$0xff]   ;;  %v978_v21 = vld [vmem:[#allocation5 + $0xa4] ss:$16 sps:$4 sm:$0xff]   ;;  %v980_v22 = vld [vmem:[#allocation5 + $0xac] ss:$16 sps:$4 sm:$0xff]  }
  0x3f   :  { %289 = vmatprep.subr.bf16.mxu0 %v960_v9  ;;  %332 = vmatprep.subr.bf16.mxu1 %v962_v10  ;;  %v982_v23 = vld [vmem:[#allocation5 + $0xa0] ss:$16 sps:$4 sm:$0xff]   ;;  %v983_v24 = vld [vmem:[#allocation5 + $0xa8] ss:$16 sps:$4 sm:$0xff]   ;;  %v984_v25 = vld [vmem:[#allocation5 + $0xc4] ss:$16 sps:$4 sm:$0xff]  }
  0x40   :  { %v986_v26 = vld [vmem:[#allocation5 + $0xcc] ss:$16 sps:$4 sm:$0xff]   ;;  %v988_v27 = vld [vmem:[#allocation5 + $0xc0] ss:$16 sps:$4 sm:$0xff]   ;;  %v989_v28 = vld [vmem:[#allocation5 + $0xc8] ss:$16 sps:$4 sm:$0xff]  }
  0x41   :  { %v990_v29 = vld [vmem:[#allocation5 + $0xe4] ss:$16 sps:$4 sm:$0xff]   ;;  %v992_v30 = vld [vmem:[#allocation5 + $0xec] ss:$16 sps:$4 sm:$0xff]   ;;  %v994_v31 = vld [vmem:[#allocation5 + $0xe0] ss:$16 sps:$4 sm:$0xff]  }
  0x42   :  { %290 = vmatpush1.bf16.msra.mxu0 %v964_v11  ;;  %333 = vmatpush1.bf16.msra.mxu1 %v965_v12  ;;  %v995_v32 = vld [vmem:[#allocation5 + $0xe8] ss:$16 sps:$4 sm:$0xff]   ;;  %v997_v34 = vld [vmem:[#allocation7 + $0x40] sm:$0xff]   ;;  %v1005_v42 = vld [vmem:[#allocation7 + $0x50] sm:$0xff]   ;;  %v100_v3 = vshrl.u32 %v99_v2, 7  ;;  %s1147_s8 = smov [#allocation8]  }
  0x43   :  { %291 = vmatprep.subr.bf16.mxu0 %v966_v13  ;;  %334 = vmatprep.subr.bf16.mxu1 %v968_v14  ;;  %v998_v35 = vld [vmem:[#allocation7 + $0xc0] sm:$0xff]   ;;  %v1001_v38 = vld [vmem:[#allocation7 + $0x48] sm:$0xff]   ;;  %v1006_v43 = vld [vmem:[#allocation7 + $0xd0] sm:$0xff]   ;;  %s807_s9 = sshll.u32 %s1147_s8, 4  ;;  %s808_s9 = int_to_ptr.vmem [resolvable:$true] %s807_s9 }
  0x44   :  { %v999_v36 = vld [vmem:[#allocation7] sm:$0xff]   ;;  %v1002_v39 = vld [vmem:[#allocation7 + $0xc8] sm:$0xff]   ;;  %v1007_v44 = vld [vmem:[#allocation7 + $0x10] sm:$0xff]   ;;  %v101_v4 = vsub.s32 0, %v100_v3  ;;  %v109_v5 = vsub.s32 2, %v100_v3  ;;  %v105_v7 = vsub.s32 1, %v100_v3  ;;  %p1116_p11 = scmp.lt.s32.totalorder %s808_s9, %s808_s9 }
  0x45   :  { %v1000_v37 = vld [vmem:[#allocation7 + $0x80] sm:$0xff]   ;;  %v1003_v40 = vld [vmem:[#allocation7 + $0x8] sm:$0xff]   ;;  %v1008_v45 = vld [vmem:[#allocation7 + $0x90] sm:$0xff]   ;;  %v113_v8 = vsub.s32 3, %v100_v3 }
  0x46   :  { %292 = vmatpush1.bf16.msra.mxu0 %v970_v15  ;;  %335 = vmatpush1.bf16.msra.mxu1 %v971_v16  ;;  %v1004_v41 = vld [vmem:[#allocation7 + $0x88] sm:$0xff]   ;;  %v1009_v46 = vld [vmem:[#allocation7 + $0x58] sm:$0xff]   ;;  %v1013_v50 = vld [vmem:[#allocation7 + $0x60] sm:$0xff]  }
  0x47   :  { %293 = vmatprep.subr.bf16.mxu0 %v972_v17  ;;  %336 = vmatprep.subr.bf16.mxu1 %v974_v18  ;;  %v1010_v47 = vld [vmem:[#allocation7 + $0xd8] sm:$0xff]   ;;  %v1014_v51 = vld [vmem:[#allocation7 + $0xe0] sm:$0xff]   ;;  %v1017_v54 = vld [vmem:[#allocation7 + $0x68] sm:$0xff]  }
  0x48   :  { %v1011_v48 = vld [vmem:[#allocation7 + $0x18] sm:$0xff]   ;;  %v1015_v52 = vld [vmem:[#allocation7 + $0x20] sm:$0xff]   ;;  %v1018_v55 = vld [vmem:[#allocation7 + $0xe8] sm:$0xff]  }
  0x49   :  { %v1012_v49 = vld [vmem:[#allocation7 + $0x98] sm:$0xff]   ;;  %v1016_v53 = vld [vmem:[#allocation7 + $0xa0] sm:$0xff]   ;;  %v1019_v56 = vld [vmem:[#allocation7 + $0x28] sm:$0xff]  }
  0x4a   :  { %294 = vmatpush1.bf16.msra.mxu0 %v976_v19  ;;  %337 = vmatpush1.bf16.msra.mxu1 %v977_v20  ;;  %v1020_v57 = vld [vmem:[#allocation7 + $0xa8] sm:$0xff]   ;;  %v1021_v58 = vld [vmem:[#allocation7 + $0x70] sm:$0xff]   ;;  %v1025_v62 = vld [vmem:[#allocation7 + $0x78] sm:$0xff]  }
  0x4b   :  { %295 = vmatprep.subr.bf16.mxu0 %v978_v21  ;;  %338 = vmatprep.subr.bf16.mxu1 %v980_v22  ;;  %v1022_v59 = vld [vmem:[#allocation7 + $0xf0] sm:$0xff]   ;;  %v1026_v63 = vld [vmem:[#allocation7 + $0xf8] sm:$0xff]  }
  0x4c   :  { %v1023_v60 = vld [vmem:[#allocation7 + $0x30] sm:$0xff]   ;;  %v1027_v0 = vld [vmem:[#allocation7 + $0x38] sm:$0xff]  }
  0x4d   :  { %v1024_v61 = vld [vmem:[#allocation7 + $0xb0] sm:$0xff]   ;;  %v1028_v1 = vld [vmem:[#allocation7 + $0xb8] sm:$0xff]  }
  0x4e   :  { %296 = vmatpush1.bf16.msra.mxu0 %v982_v23  ;;  %339 = vmatpush1.bf16.msra.mxu1 %v983_v24  ;;  %v97_v6 = vld [vmem:[%s1299_s2] sm:$0xf] }
  0x4f   :  { %297 = vmatprep.subr.bf16.mxu0 %v984_v25  ;;  %340 = vmatprep.subr.bf16.mxu1 %v986_v26  ;;  %v102_v9 = vrot.slane %v97_v6, %v101_v4  ;;  %v110_v10 = vrot.slane %v97_v6, %v109_v5  ;;  %v106_v11 = vrot.slane %v97_v6, %v105_v7 }
  0x50   :  { %v114_v12 = vrot.slane %v97_v6, %v113_v8 }
  0x52   :  { %298 = vmatpush1.bf16.msra.mxu0 %v988_v27  ;;  %341 = vmatpush1.bf16.msra.mxu1 %v989_v28 }
  0x53   :  { %299 = vmatprep.subr.bf16.mxu0 %v990_v29  ;;  %342 = vmatprep.subr.bf16.mxu1 %v992_v30 }
  0x56   :  { %300 = vmatpush1.bf16.msra.mxu0 %v994_v31  ;;  %343 = vmatpush1.bf16.msra.mxu1 %v995_v32 }
  0x57   :  { %895 = vmatprep.subr.bf16.mxu0 %v997_v34  ;;  %917 = vmatprep.subr.bf16.mxu1 %v998_v35 }
  0x59   :  { %318 = vmatmul.mubr.bf16.vlgmr.msra.gmra.mrb[0].mxu0 %v996_v33  ;;  %361 = vmatmul.mubr.bf16.vlgmr.msra.gmra.mrb[0].mxu1 %v996_v33 }
  0x5a   :  { %896 = vmatpush3.bf16.msra.mxu0 %v999_v36  ;;  %918 = vmatpush3.bf16.msra.mxu1 %v1000_v37 }
  0x5b   :  { %897 = vmatprep.subr.bf16.mxu0 %v1001_v38  ;;  %919 = vmatprep.subr.bf16.mxu1 %v1002_v39 }
  0x5e   :  { %898 = vmatpush3.bf16.msra.mxu0 %v1003_v40  ;;  %920 = vmatpush3.bf16.msra.mxu1 %v1004_v41 }
  0x5f   :  { %899 = vmatprep.subr.bf16.mxu0 %v1005_v42  ;;  %921 = vmatprep.subr.bf16.mxu1 %v1006_v43 }
  0x62   :  { %900 = vmatpush3.bf16.msra.mxu0 %v1007_v44  ;;  %922 = vmatpush3.bf16.msra.mxu1 %v1008_v45 }
  0x63   :  { %901 = vmatprep.subr.bf16.mxu0 %v1009_v46  ;;  %923 = vmatprep.subr.bf16.mxu1 %v1010_v47 }
  0x66   :  { %902 = vmatpush3.bf16.msra.mxu0 %v1011_v48  ;;  %924 = vmatpush3.bf16.msra.mxu1 %v1012_v49 }
  0x67   :  { %903 = vmatprep.subr.bf16.mxu0 %v1013_v50  ;;  %925 = vmatprep.subr.bf16.mxu1 %v1014_v51 }
  0x6a   :  { %904 = vmatpush3.bf16.msra.mxu0 %v1015_v52  ;;  %926 = vmatpush3.bf16.msra.mxu1 %v1016_v53 }
  0x6b   :  { %905 = vmatprep.subr.bf16.mxu0 %v1017_v54  ;;  %927 = vmatprep.subr.bf16.mxu1 %v1018_v55 }
  0x6e   :  { %906 = vmatpush3.bf16.msra.mxu0 %v1019_v56  ;;  %928 = vmatpush3.bf16.msra.mxu1 %v1020_v57 }
  0x6f   :  { %907 = vmatprep.subr.bf16.mxu0 %v1021_v58  ;;  %929 = vmatprep.subr.bf16.mxu1 %v1022_v59 }
  0x72   :  { %908 = vmatpush3.bf16.msra.mxu0 %v1023_v60  ;;  %930 = vmatpush3.bf16.msra.mxu1 %v1024_v61 }
  0x73   :  { %909 = vmatprep.subr.bf16.mxu0 %v1025_v62  ;;  %931 = vmatprep.subr.bf16.mxu1 %v1026_v63 }
  0x76   :  { %910 = vmatpush3.bf16.msra.mxu0 %v1027_v0  ;;  %932 = vmatpush3.bf16.msra.mxu1 %v1028_v1 }
 0x12c   :  { %v319_v13 = vpop.f32.mrb[0].mxu0  ;;  %v362_v14 = vpop.f32.mrb[0].mxu1 }
 0x12d   :  { %v1223_v15 = vadd.f32 %v319_v13, %v102_v9  ;;  %v1225_v16 = vadd.f32 %v362_v14, %v110_v10  ;;  %v321_v17 = vpop.f32.mrb[1].mxu0  ;;  %v364_v18 = vpop.f32.mrb[1].mxu1 }
 0x12e   :  { %v1227_v19 = vadd.f32 %v321_v17, %v106_v11  ;;  %v1229_v20 = vadd.f32 %v364_v18, %v114_v12  ;;  %v323_v21 = vpop.f32.mrb[2].mxu0  ;;  %v366_v22 = vpop.f32.mrb[2].mxu1 }
 0x12f   :  { %v371_v23 = vmul.f32 %v1223_v15, %v1223_v15  ;;  %v373_v24 = vmul.f32 %v1225_v16, %v1225_v16  ;;  %v1235_v25 = vadd.f32 %v323_v21, %v102_v9  ;;  %v1237_v26 = vadd.f32 %v366_v22, %v110_v10  ;;  %v325_v27 = vpop.f32.mrb[3].mxu0  ;;  %v368_v28 = vpop.f32.mrb[3].mxu1 }
 0x130   :  { %v372_v29 = vmul.f32 %v1227_v19, %v1227_v19  ;;  %v374_v30 = vmul.f32 %v1229_v20, %v1229_v20  ;;  %v1243_v31 = vadd.f32 %v325_v27, %v106_v11  ;;  %v1245_v32 = vadd.f32 %v368_v28, %v114_v12 }
 0x131   :  { %v379_v33 = vmul.f32 %v371_v23, %v1223_v15  ;;  %v381_v34 = vmul.f32 %v373_v24, %v1225_v16  ;;  %v375_v35 = vmul.f32 %v1235_v25, %v1235_v25  ;;  %v377_v36 = vmul.f32 %v1237_v26, %v1237_v26 }
 0x132   :  { %v380_v37 = vmul.f32 %v372_v29, %v1227_v19  ;;  %v382_v38 = vmul.f32 %v374_v30, %v1229_v20  ;;  %v376_v39 = vmul.f32 %v1243_v31, %v1243_v31  ;;  %v378_v40 = vmul.f32 %v1245_v32, %v1245_v32 }
 0x133   :  { %v387_v41 = vmul.f32 0.044715, %v379_v33  ;;  %v389_v42 = vmul.f32 0.044715, %v381_v34  ;;  %v383_v43 = vmul.f32 %v375_v35, %v1235_v25  ;;  %v385_v44 = vmul.f32 %v377_v36, %v1237_v26 }
 0x134   :  { %v388_v45 = vmul.f32 0.044715, %v380_v37  ;;  %v390_v46 = vmul.f32 0.044715, %v382_v38  ;;  %v384_v47 = vmul.f32 %v376_v39, %v1243_v31  ;;  %v386_v48 = vmul.f32 %v378_v40, %v1245_v32 }
 0x135   :  { %v395_v49 = vadd.f32 %v387_v41, %v1223_v15  ;;  %v397_v50 = vadd.f32 %v389_v42, %v1225_v16  ;;  %v391_v51 = vmul.f32 0.044715, %v383_v43  ;;  %v393_v52 = vmul.f32 0.044715, %v385_v44 }
 0x136   :  { %v396_v53 = vadd.f32 %v388_v45, %v1227_v19  ;;  %v398_v54 = vadd.f32 %v390_v46, %v1229_v20  ;;  %v392_v55 = vmul.f32 0.044715, %v384_v47  ;;  %v394_v56 = vmul.f32 0.044715, %v386_v48 }
 0x137   :  { %v403_v57 = vmul.f32 0.7978846, %v395_v49  ;;  %v405_v58 = vmul.f32 0.7978846, %v397_v50  ;;  %v399_v59 = vadd.f32 %v391_v51, %v1235_v25  ;;  %v401_v60 = vadd.f32 %v393_v52, %v1237_v26 }
 0x138   :  { %v404_v61 = vmul.f32 0.7978846, %v396_v53  ;;  %v406_v62 = vmul.f32 0.7978846, %v398_v54  ;;  %v400_v63 = vadd.f32 %v392_v55, %v1243_v31  ;;  %v402_v0 = vadd.f32 %v394_v56, %v1245_v32 }
 0x139   :  { %1029 = vtanh.f32 %v403_v57  ;;  %v407_v1 = vmul.f32 0.7978846, %v399_v59  ;;  %v409_v2 = vmul.f32 0.7978846, %v401_v60 }
 0x13a   :  { %1031 = vtanh.f32 %v405_v58  ;;  %v408_v3 = vmul.f32 0.7978846, %v400_v63  ;;  %v410_v4 = vmul.f32 0.7978846, %v402_v0 }
 0x13b   :  { %1033 = vtanh.f32 %v404_v61 }
 0x13c   :  { %1035 = vtanh.f32 %v406_v62 }
 0x13d   :  { %1037 = vtanh.f32 %v407_v1 }
 0x13e   :  { %1039 = vtanh.f32 %v409_v2 }
 0x13f   :  { %1041 = vtanh.f32 %v408_v3 }
 0x140   :  { %1043 = vtanh.f32 %v410_v4 }
 0x143   :  { %v1030_v5 = vpop.eup %1029 }
 0x144   :  { %v1032_v6 = vpop.eup %1031  ;;  %v419_v7 = vadd.f32 1.0, %v1030_v5 }
 0x145   :  { %v1034_v8 = vpop.eup %1033  ;;  %v421_v9 = vadd.f32 1.0, %v1032_v6 }
 0x146   :  { %v1036_v10 = vpop.eup %1035  ;;  %v420_v11 = vadd.f32 1.0, %v1034_v8  ;;  %v427_v17 = vmul.f32 0.5, %v419_v7 }
 0x147   :  { %v1038_v12 = vpop.eup %1037  ;;  %v422_v13 = vadd.f32 1.0, %v1036_v10  ;;  %v429_v22 = vmul.f32 0.5, %v421_v9 }
 0x148   :  { %v1040_v14 = vpop.eup %1039  ;;  %v423_v18 = vadd.f32 1.0, %v1038_v12  ;;  %v428_v29 = vmul.f32 0.5, %v420_v11  ;;  %v435_v35 = vmul.f32 %v427_v17, %v1223_v15 }
 0x149   :  { %v1042_v21 = vpop.eup %1041  ;;  %v425_v23 = vadd.f32 1.0, %v1040_v14  ;;  %v430_v34 = vmul.f32 0.5, %v422_v13  ;;  %v437_v38 = vmul.f32 %v429_v22, %v1225_v16 }
 0x14a   :  { %v1044_v24 = vpop.eup %1043  ;;  %v431_v27 = vmul.f32 0.5, %v423_v18  ;;  %v424_v28 = vadd.f32 1.0, %v1042_v21  ;;  %v436_v41 = vmul.f32 %v428_v29, %v1227_v19  ;;  %v853_v19 = vld [vmem:[%s1301_s4] ss:$0 sm:$0xff]  ;;  %s1111_s4 = scalar_lea.vmem %s808_s9, 128 }
 0x14b   :  { %v433_v30 = vmul.f32 0.5, %v425_v23  ;;  %v426_v33 = vadd.f32 1.0, %v1044_v24  ;;  %v438_v44 = vmul.f32 %v430_v34, %v1229_v20  ;;  %p1112_p10 = scmp.ne.s32.totalorder %s808_s9, %s1111_s4  ;;  %p1117_p12 = scmp.lt.s32.totalorder %s1111_s4, %s1111_s4 }
 0x14c   :  { %v439_v36 = vmul.f32 %v431_v27, %v1235_v25  ;;  %v432_v37 = vmul.f32 0.5, %v424_v28 }
 0x14d   :  { %v441_v39 = vmul.f32 %v433_v30, %v1237_v26  ;;  %v434_v40 = vmul.f32 0.5, %v426_v33  ;;  %p1118_p13 = por %p1117_p12, %p1116_p11 }
 0x14e   :  { %v440_v42 = vmul.f32 %v432_v37, %v1243_v31  ;;  %v443_v43 = vpack.c.bf16 %v439_v36, %v435_v35 }
 0x14f   :  { %v442_v45 = vmul.f32 %v434_v40, %v1245_v32  ;;  %v445_v46 = vpack.c.bf16 %v441_v39, %v437_v38  ;;  %p1119_p0 = pnand %p1118_p13, %p1112_p10 }
 0x150   :  { %v444_v47 = vpack.c.bf16 %v440_v42, %v436_v41 }
 0x151   :  { %v446_v15 = vpack.c.bf16 %v442_v45, %v438_v44 }
 0x152   :  { %742 = vmatprep.mubr.bf16.mxu0 %v444_v47 }
 0x153   :  { %783 = vmatprep.mubr.bf16.mxu1 %v446_v15  ;;  %743 = vmatmul.mubr.bf16.vlgmr.msra.gmra.mrb[4].mxu0 %v443_v43 }
 0x154   :  { %784 = vmatmul.mubr.bf16.vlgmr.msra.gmra.mrb[4].mxu1 %v445_v46 }
 0x226   :  { %v911_v16 = vpop.f32.mrb[4].mxu0 }
 0x227   :  { %v933_v25 = vpop.f32.mrb[4].mxu1  ;;  %v912_v26 = vpop.f32.mrb[5].mxu0 }
 0x228   :  { %v913_v31 = vadd.f32 %v912_v26, %v911_v16  ;;  %v934_v48 = vpop.f32.mrb[5].mxu1  ;;  %v914_v49 = vpop.f32.mrb[6].mxu0 }
 0x229   :  { %v935_v20 = vadd.f32 %v934_v48, %v933_v25  ;;  %v936_v50 = vpop.f32.mrb[6].mxu1  ;;  %v915_v32 = vpop.f32.mrb[7].mxu0 }
 0x22a   :  { %v745_v51 = vadd.f32 %v913_v31, %v853_v19  ;;  %v916_v52 = vadd.f32 %v915_v32, %v914_v49  ;;  %v937_v53 = vpop.f32.mrb[7].mxu1 }
 0x22b   :  { %v938_v54 = vadd.f32 %v937_v53, %v936_v50 }
 0x22c   :  { %v786_v55 = vadd.f32 %v935_v20, %v745_v51  ;;  %v748_v56 = vadd.f32 %v916_v52, %v853_v19 }
 0x22e   :  { %v789_v57 = vadd.f32 %v938_v54, %v748_v56 }
 0x230   :  { %v893_v58 = vpack.c.bf16 %v789_v57, %v786_v55 }
 0x232   :  { %894 = vst [vmem:[#allocation8] sm:$0xff] %v893_v58  }
 0x233   :  { %1122 = shalt.err (!%p1119_p0)
}
 0x234   :  { %s1123_s12 = scalar_lea.hbm %s1302_s5, 128 }
 0x235   :  { %p1124_p1 = scmp.ne.s32.totalorder %s1302_s5, %s1123_s12  ;;  %p1127_p2 = scmp.lt.u32.totalorder %s1123_s12, %s1302_s5 }
 0x237   :  { %p1129_p3 = pnand %p1127_p2, %p1124_p1 }
 0x239   :  { %1132 = shalt.err (!%p1129_p3)
}
 0x23a   :  { %813 = dma.vmem_to_hbm [thread:$0]  %s808_s9, 128, %s1302_s5, [#allocation4], %s1143_s1, %s1143_s1, %s1144_s17  }
 0x23b   :  { %1137 = dma.done.wait [#allocation4], 128  }
 0x23c   :  { %1138 = vsyncadd [#allocation4], 4294967168 }
 0x23d   :  { %817 = vsyncpa [#allocation3], 1 }
 0x23e   :  { %818 = vsyncpa [#allocation6], 1 }
 0x23f   :  { %819 = vsyncpa [#allocation4], 1 }

</bundles_post_ra>
